<compile_context>
chip_gen: v6e
topology: v6e:2x2x1
jax: 0.10.0
libtpu: 0.0.40
codegen_flags: <defaults>
</compile_context>

<pallas_src>
import functools

import jax
import jax.numpy as jnp
from jax import lax
from jax.experimental import pallas as pl
from jax.experimental.pallas import tpu as pltpu


def _bayes_bn_kernel(x_ref, w_ref, b_ref, o_ref, mean_ref, var_ref, *, eps):
    # x_ref: (N, cb, HW)   w_ref/b_ref: (N, cb, 1)
    # o_ref: (N, cb, HW)   mean_ref/var_ref: (cb, 1)
    x = x_ref[...].astype(jnp.float32)

    # F.batch_norm with training=True: per-channel batch statistics over
    # (N, HW), biased variance (denominator N*HW).  Two-pass form matches
    # the reference numerics (no E[x^2]-E[x]^2 cancellation).
    mean = jnp.mean(x, axis=(0, 2), keepdims=True)                 # (1,cb,1)
    centered = x - mean
    var = jnp.mean(centered * centered, axis=(0, 2), keepdims=True)
    inv_std = lax.rsqrt(var + eps)                                 # (1,cb,1)

    # torch.addcmul(bias, weight, x_hat) with per-sample, per-channel w/b
    # (already mul_exp_add'ed in the wrapper), folded into one FMA per
    # element: out = centered * (inv_std * w) + b.
    w = w_ref[...].astype(jnp.float32)                             # (N,cb,1)
    b = b_ref[...].astype(jnp.float32)
    scale = inv_std * w                                            # (N,cb,1)
    o_ref[...] = (centered * scale + b).astype(o_ref.dtype)

    # Per-channel batch stats for the running-stats EMA (avoids a second
    # HBM pass over x in the wrapper).
    mean_ref[...] = mean[0].astype(mean_ref.dtype)                 # (cb,1)
    var_ref[...] = var[0].astype(var_ref.dtype)


def _choose_channel_block(N, C, HW, itemsize,
                          vmem_budget_bytes=24 * 1024 * 1024):
    """Largest channel block whose per-step VMEM footprint fits the budget,
    preferring an even, >=2-step grid (v7x megacore sharding).

    Footprint per channel of block:
      in tile + out tile (double-buffered by the pipeline)  -> 2*2*itemsize
      f32 intermediates (x_f32 / centered) held in VMEM     -> 2*4
    """
    per_chan_bytes = (2 * 2 * itemsize + 2 * 4) * N * HW
    candidates = [cb for cb in range(1, C + 1)
                  if C % cb == 0 and (cb % 8 == 0 or cb == C)]
    fitting = [cb for cb in candidates
               if cb * per_chan_bytes <= vmem_budget_bytes]
    multi_step_even = [cb for cb in fitting
                       if (C // cb) >= 2 and (C // cb) % 2 == 0]
    if multi_step_even:
        return max(multi_step_even)
    if fitting:
        return max(fitting)
    # TODO(synk): if even the smallest legal block overflows VMEM, switch to
    # a two-phase accumulate-then-finalize kernel that tiles (N, HW) too.
    return min(candidates)


def bayes_batchnorm_mf_forward(x, weight_mu, weight_psi, bias_mu, bias_psi,
                               noise_w, noise_b, running_mean, running_var,
                               *, eps=1e-5, momentum=0.1, channel_block=None):
    """Forward pass of _BayesBatchNormMF (training=True, affine=True,
    track_running_stats=True, deterministic=False, parallel_eval=False).

    x: [N, C, H, W] (NCHW).  noise_w/noise_b: [N, C] standard-normal samples
    (the torch.randn(bs, num_features) draws).
    Returns (out [N, C, H, W], new_running_mean [C], new_running_var [C]).
    """
    N, C, H, W = x.shape
    HW = H * W
    dtype = x.dtype
    itemsize = jnp.dtype(dtype).itemsize

    # --- Free reshape (NCHW is contiguous): no transpose, no extra HBM pass.
    x_k = x.reshape(N, C, HW)

    # --- mul_exp_add on tiny [N, C] tensors in the wrapper:
    #     weight = noise * exp(psi) + mu   (per-sample, per-channel)
    w = (noise_w.astype(jnp.float32)
         * jnp.exp(weight_psi.astype(jnp.float32))[None, :]
         + weight_mu.astype(jnp.float32)[None, :])
    b = (noise_b.astype(jnp.float32)
         * jnp.exp(bias_psi.astype(jnp.float32))[None, :]
         + bias_mu.astype(jnp.float32)[None, :])
    w_k = w.reshape(N, C, 1)
    b_k = b.reshape(N, C, 1)

    cb = (channel_block if channel_block is not None
          else _choose_channel_block(N, C, HW, itemsize))
    assert C % cb == 0 and (cb % 8 == 0 or cb == C), (
        "channel block must divide C and be a multiple of 8 (or equal C)")
    grid = (C // cb,)

    # TODO(synk): if HW % 128 != 0 the output stores fall back to masked
    # partial stores; pad/fold the lane axis for peak store bandwidth.
    out_k, mean_k, var_k = pl.pallas_call(
        functools.partial(_bayes_bn_kernel, eps=eps),
        out_shape=(
            jax.ShapeDtypeStruct((N, C, HW), dtype),
            jax.ShapeDtypeStruct((C, 1), jnp.float32),
            jax.ShapeDtypeStruct((C, 1), jnp.float32),
        ),
        grid_spec=pltpu.PrefetchScalarGridSpec(
            num_scalar_prefetch=0,
            grid=grid,
            in_specs=[
                pl.BlockSpec((N, cb, HW), lambda c: (0, c, 0)),   # x
                pl.BlockSpec((N, cb, 1), lambda c: (0, c, 0)),    # weight
                pl.BlockSpec((N, cb, 1), lambda c: (0, c, 0)),    # bias
            ],
            out_specs=(
                pl.BlockSpec((N, cb, HW), lambda c: (0, c, 0)),   # out
                pl.BlockSpec((cb, 1), lambda c: (c, 0)),          # batch mean
                pl.BlockSpec((cb, 1), lambda c: (c, 0)),          # batch var
            ),
        ),
        compiler_params=pltpu.CompilerParams(
            dimension_semantics=("parallel",),
            vmem_limit_bytes=32 * 1024 * 1024,
        ),
    )(x_k, w_k, b_k)

    out = out_k.reshape(N, C, H, W)

    # Running-stats EMA (stateful buffer mutation in PyTorch; returned here).
    # Uses the kernel's per-channel stats -> no extra HBM pass over x.
    # TODO(synk): num_batches_tracked += 1 (long buffer) is tracked by the
    # caller, not returned here.
    batch_mean = mean_k.reshape(C)
    batch_var_biased = var_k.reshape(C)
    n = N * H * W
    bessel = n / (n - 1) if n > 1 else 1.0
    batch_var_unbiased = batch_var_biased * bessel
    new_rm = (1.0 - momentum) * running_mean + momentum * batch_mean
    new_rv = (1.0 - momentum) * running_var + momentum * batch_var_unbiased

    return out, new_rm, new_rv


def _reference_forward(x, weight_mu, weight_psi, bias_mu, bias_psi,
                       noise_w, noise_b, running_mean, running_var,
                       eps=1e-5, momentum=0.1):
    xf = x.astype(jnp.float32)
    mean = jnp.mean(xf, axis=(0, 2, 3), keepdims=True)
    var = jnp.var(xf, axis=(0, 2, 3), keepdims=True)
    x_hat = (xf - mean) / jnp.sqrt(var + eps)
    w = noise_w * jnp.exp(weight_psi)[None, :] + weight_mu[None, :]   # [N,C]
    b = noise_b * jnp.exp(bias_psi)[None, :] + bias_mu[None, :]
    out = (x_hat * w[:, :, None, None] + b[:, :, None, None]).astype(x.dtype)
    n = x.shape[0] * x.shape[2] * x.shape[3]
    rm = (1.0 - momentum) * running_mean + momentum * mean.reshape(-1)
    rv = (1.0 - momentum) * running_var + momentum * (
        var.reshape(-1) * (n / (n - 1)))
    return out, rm, rv


if __name__ == "__main__":
    key = jax.random.PRNGKey(0)
    kx, kwp, kbp, knw, knb = jax.random.split(key, 5)

    N, C, H, W = 2, 4, 16, 16
    num_features = C
    eps, momentum = 1e-5, 0.1

    x = jax.random.normal(kx, (N, C, H, W), dtype=jnp.float32)

    # Parameter init per reset_parameters():
    weight_mu = jnp.ones((num_features,), jnp.float32)
    weight_psi = jax.random.uniform(kwp, (num_features,), jnp.float32, -6.0, -5.0)
    bias_mu = jnp.zeros((num_features,), jnp.float32)
    bias_psi = jax.random.uniform(kbp, (num_features,), jnp.float32, -6.0, -5.0)
    running_mean = jnp.zeros((num_features,), jnp.float32)
    running_var = jnp.ones((num_features,), jnp.float32)

    # Per-sample standard-normal noise (torch.randn(bs, num_features)).
    noise_w = jax.random.normal(knw, (N, num_features), jnp.float32)
    noise_b = jax.random.normal(knb, (N, num_features), jnp.float32)

    out, new_rm, new_rv = bayes_batchnorm_mf_forward(
        x, weight_mu, weight_psi, bias_mu, bias_psi, noise_w, noise_b,
        running_mean, running_var, eps=eps, momentum=momentum)
    jax.block_until_ready(out)

    ref_out, ref_rm, ref_rv = _reference_forward(
        x, weight_mu, weight_psi, bias_mu, bias_psi, noise_w, noise_b,
        running_mean, running_var, eps=eps, momentum=momentum)
    assert jnp.allclose(out, ref_out, atol=1e-4, rtol=1e-4), "out mismatch"
    assert jnp.allclose(new_rm, ref_rm, atol=1e-5, rtol=1e-5), "running_mean mismatch"
    assert jnp.allclose(new_rv, ref_rv, atol=1e-5, rtol=1e-5), "running_var mismatch"

    # TODO(synk): parallel_eval / deterministic / eval-mode (running-stats
    # normalization) and 2D-input branches are not implemented; only the
    # training-mode 4D NCHW hot path is.
    print("KERNEL_OK")
</pallas_src>

<mosaic_0001>
module attributes {stable_mosaic.version = 11 : i64} {
  func.func @_bayes_bn_kernel(%arg0: i32, %arg1: memref<2x4x256xf32, #tpu.memory_space<vmem>>, %arg2: memref<2x4x1xf32, #tpu.memory_space<vmem>>, %arg3: memref<2x4x1xf32, #tpu.memory_space<vmem>>, %arg4: memref<2x4x256xf32, #tpu.memory_space<vmem>>, %arg5: memref<4x1xf32, #tpu.memory_space<vmem>>, %arg6: memref<4x1xf32, #tpu.memory_space<vmem>>) attributes {dimension_semantics = [#tpu.dimension_semantics<parallel>], iteration_bounds = array<i64: 1>, scalar_prefetch = 0 : i64, scratch_operands = 0 : i64, tpu.core_type = #tpu.core_type<tc>, window_params = [{transform_indices = @transform_0, window_bounds = array<i64: 2, 4, 256>}, {transform_indices = @transform_1, window_bounds = array<i64: 2, 4, 1>}, {transform_indices = @transform_2, window_bounds = array<i64: 2, 4, 1>}, {transform_indices = @transform_3, window_bounds = array<i64: 2, 4, 256>}, {transform_indices = @transform_4, window_bounds = array<i64: 4, 1>}, {transform_indices = @transform_5, window_bounds = array<i64: 4, 1>}]} {
    %c0 = arith.constant 0 : index
    %c0_0 = arith.constant 0 : index
    %c0_1 = arith.constant 0 : index
    %0 = vector.load %arg1[%c0, %c0_0, %c0_1] : memref<2x4x256xf32, #tpu.memory_space<vmem>>, vector<2x4x256xf32>
    %cst = arith.constant dense<0.000000e+00> : vector<4xf32>
    %1 = vector.multi_reduction <add>, %0, %cst [0, 2] : vector<2x4x256xf32> to vector<4xf32>
    %2 = vector.shape_cast %1 : vector<4xf32> to vector<1x4x1xf32>
    %cst_2 = arith.constant 5.120000e+02 : f32
    %3 = vector.broadcast %cst_2 : f32 to vector<1x4x1xf32>
    %4 = arith.divf %2, %3 : vector<1x4x1xf32>
    %5 = vector.broadcast %4 : vector<1x4x1xf32> to vector<2x4x256xf32>
    %6 = arith.subf %0, %5 : vector<2x4x256xf32>
    %7 = arith.mulf %6, %6 : vector<2x4x256xf32>
    %cst_3 = arith.constant dense<0.000000e+00> : vector<4xf32>
    %8 = vector.multi_reduction <add>, %7, %cst_3 [0, 2] : vector<2x4x256xf32> to vector<4xf32>
    %9 = vector.shape_cast %8 : vector<4xf32> to vector<1x4x1xf32>
    %cst_4 = arith.constant 5.120000e+02 : f32
    %10 = vector.broadcast %cst_4 : f32 to vector<1x4x1xf32>
    %11 = arith.divf %9, %10 : vector<1x4x1xf32>
    %cst_5 = arith.constant 9.99999974E-6 : f32
    %12 = vector.broadcast %cst_5 : f32 to vector<1x4x1xf32>
    %13 = arith.addf %11, %12 : vector<1x4x1xf32>
    %14 = math.rsqrt %13 : vector<1x4x1xf32>
    %c0_6 = arith.constant 0 : index
    %c0_7 = arith.constant 0 : index
    %c0_8 = arith.constant 0 : index
    %15 = vector.load %arg2[%c0_6, %c0_7, %c0_8] : memref<2x4x1xf32, #tpu.memory_space<vmem>>, vector<2x4x1xf32>
    %c0_9 = arith.constant 0 : index
    %c0_10 = arith.constant 0 : index
    %c0_11 = arith.constant 0 : index
    %16 = vector.load %arg3[%c0_9, %c0_10, %c0_11] : memref<2x4x1xf32, #tpu.memory_space<vmem>>, vector<2x4x1xf32>
    %17 = vector.broadcast %14 : vector<1x4x1xf32> to vector<2x4x1xf32>
    %18 = arith.mulf %17, %15 : vector<2x4x1xf32>
    %19 = vector.broadcast %18 : vector<2x4x1xf32> to vector<2x4x256xf32>
    %20 = arith.mulf %6, %19 : vector<2x4x256xf32>
    %21 = vector.broadcast %16 : vector<2x4x1xf32> to vector<2x4x256xf32>
    %22 = arith.addf %20, %21 : vector<2x4x256xf32>
    %c0_12 = arith.constant 0 : index
    %c0_13 = arith.constant 0 : index
    %c0_14 = arith.constant 0 : index
    %23 = vector.load %arg4[%c0_12, %c0_13, %c0_14] : memref<2x4x256xf32, #tpu.memory_space<vmem>>, vector<2x4x256xf32>
    tpu.vector_store %arg4[%c0_12, %c0_13, %c0_14], %22 {strides = array<i32>} : memref<2x4x256xf32, #tpu.memory_space<vmem>>, vector<2x4x256xf32>,
    %24 = vector.shape_cast %4 : vector<1x4x1xf32> to vector<4x1xf32>
    %c0_15 = arith.constant 0 : index
    %c0_16 = arith.constant 0 : index
    %25 = vector.load %arg5[%c0_15, %c0_16] : memref<4x1xf32, #tpu.memory_space<vmem>>, vector<4x1xf32>
    tpu.vector_store %arg5[%c0_15, %c0_16], %24 {strides = array<i32>} : memref<4x1xf32, #tpu.memory_space<vmem>>, vector<4x1xf32>,
    %26 = vector.shape_cast %11 : vector<1x4x1xf32> to vector<4x1xf32>
    %c0_17 = arith.constant 0 : index
    %c0_18 = arith.constant 0 : index
    %27 = vector.load %arg6[%c0_17, %c0_18] : memref<4x1xf32, #tpu.memory_space<vmem>>, vector<4x1xf32>
    tpu.vector_store %arg6[%c0_17, %c0_18], %26 {strides = array<i32>} : memref<4x1xf32, #tpu.memory_space<vmem>>, vector<4x1xf32>,
    return
  }
  func.func @transform_0(%arg0: i32) -> (i32, i32, i32) {
    %c0_i32 = arith.constant 0 : i32
    %c0_i32_0 = arith.constant 0 : i32
    %c0_i32_1 = arith.constant 0 : i32
    return %c0_i32, %arg0, %c0_i32_0 : i32, i32, i32
  }
  func.func @transform_1(%arg0: i32) -> (i32, i32, i32) {
    %c0_i32 = arith.constant 0 : i32
    %c0_i32_0 = arith.constant 0 : i32
    %c0_i32_1 = arith.constant 0 : i32
    return %c0_i32, %arg0, %c0_i32_0 : i32, i32, i32
  }
  func.func @transform_2(%arg0: i32) -> (i32, i32, i32) {
    %c0_i32 = arith.constant 0 : i32
    %c0_i32_0 = arith.constant 0 : i32
    %c0_i32_1 = arith.constant 0 : i32
    return %c0_i32, %arg0, %c0_i32_0 : i32, i32, i32
  }
  func.func @transform_3(%arg0: i32) -> (i32, i32, i32) {
    %c0_i32 = arith.constant 0 : i32
    %c0_i32_0 = arith.constant 0 : i32
    %c0_i32_1 = arith.constant 0 : i32
    return %c0_i32, %arg0, %c0_i32_0 : i32, i32, i32
  }
  func.func @transform_4(%arg0: i32) -> (i32, i32) {
    %c0_i32 = arith.constant 0 : i32
    %c0_i32_0 = arith.constant 0 : i32
    return %arg0, %c0_i32 : i32, i32
  }
  func.func @transform_5(%arg0: i32) -> (i32, i32) {
    %c0_i32 = arith.constant 0 : i32
    %c0_i32_0 = arith.constant 0 : i32
    return %arg0, %c0_i32 : i32, i32
  }
}

</mosaic_0001>

<bundles_post_ra>
// kernel: tpu_custom_call.1
= control target key start
LH: loop header
LB: loop body
LE: loop exit
PB: predicated region body
PF: predicated region fallthrough
CT: control target
= control target key end

     0   :  { %vm26_vm0 = vcmask 1043456   ;;  %s261_s0 = inlined_call_operand.vmem [shape: f32[2,4,256], index: 0, kind: input, shape index: {}]   ;;  %s262_s1 = inlined_call_operand.vmem [shape: f32[2,4,1], index: 1, kind: input, shape index: {}]   ;;  %s263_s2 = inlined_call_operand.vmem [shape: f32[2,4,1], index: 2, kind: input, shape index: {}]   ;;  %s264_s3 = inlined_call_operand.hbm [shape: f32[2,4,256], index: 3, kind: output, shape index: {0}]   ;;  %s265_s4 = inlined_call_operand.vmem [shape: f32[4,1], index: 4, kind: output, shape index: {1}]   ;;  %s266_s5 = inlined_call_operand.vmem [shape: f32[4,1], index: 5, kind: output, shape index: {2}]  }
   0x1   :  { %v18_v0 = vld [vmem:[%s261_s0] sm:$0xff]  ;;  %v19_v1 = vld [vmem:[%s261_s0 + $0x8] sm:$0xff] }
   0x2   :  { %v22_v2 = vcombine.high %v18_v0, %v18_v0  ;;  %v23_v3 = vcombine.high %v19_v1, %v19_v1  ;;  %v27_v4 = vsel %vm26_vm0, %v18_v0, 0.0 }
   0x3   :  { %11 = vsyncpa [#allocation3], 0  ;;  %v30_v6 = vsel %vm26_vm0, %v19_v1, 0.0  ;;  %v189_v11 = vmov 839922192   ;;  %v42_v13 = vlaneseq  ;;  %vm129_vm1 = vcmask 3072  }
   0x4   :  { %v28_v5 = vsel %vm26_vm0, %v22_v2, 0.0  ;;  %v32_v8 = vsel %vm26_vm0, %v23_v3, 0.0  ;;  %v40_v12 = vunpack.c.l.s4 %v189_v11  ;;  %v190_v33 = vmov 0   ;;  %v71_v34 = vld [vmem:[%s263_s2] sm:$0xf] }
   0x5   :  { %v29_v7 = vadd.f32 %v28_v5, %v27_v4  ;;  %v43_v15 = vshrl.u32 %v42_v13, 7  ;;  %161 = vset.pattern.permute.xlu1 %v190_v33  ;;  %162 = vset.pattern.permute.xlu0 %v190_v33  ;;  %v69_v38 = vld [vmem:[%s262_s1] sm:$0xf]  ;;  %v70_v41 = vld [vmem:[%s262_s1 + $0x4] sm:$0xf] }
   0x6   :  { %v41_v14 = vunpack.c.0.s8 %v40_v12  ;;  %v72_v43 = vld [vmem:[%s263_s2 + $0x4] sm:$0xf] }
   0x7   :  { %v31_v9 = vadd.f32 %v30_v6, %v29_v7 }
   0x8   :  { %v44_v16 = vsub.s32 %v41_v14, %v43_v15 }
   0x9   :  { %v33_v10 = vadd.f32 %v32_v8, %v31_v9 }
   0xb   :  { %34 = vadd.xlane.f32.xlu0 %v33_v10 }
  0x94   :  { %v35_v17 = vpop.xlane.xlu0 %34 }
  0x95   :  { %v37_v18 = vmul.f32 0.001953125, %v35_v17 }
  0x97   :  { %v45_v19 = vrot.slane %v37_v18, %v44_v16  ;;  %130 = vst.msk [vmem:[%s265_s4] sm:$0xf] %vm129_vm1, %v37_v18 }
  0x99   :  { %v47_v20 = vsub.f32 %v18_v0, %v45_v19  ;;  %v48_v21 = vsub.f32 %v19_v1, %v45_v19 }
  0x9b   :  { %v49_v22 = vmul.f32 %v47_v20, %v47_v20  ;;  %v50_v23 = vmul.f32 %v48_v21, %v48_v21 }
  0x9d   :  { %v53_v24 = vcombine.high %v49_v22, %v49_v22  ;;  %v54_v25 = vcombine.high %v50_v23, %v50_v23  ;;  %v57_v26 = vsel %vm26_vm0, %v49_v22, 0.0  ;;  %v60_v29 = vsel %vm26_vm0, %v50_v23, 0.0 }
  0x9f   :  { %v58_v27 = vsel %vm26_vm0, %v53_v24, 0.0  ;;  %v62_v31 = vsel %vm26_vm0, %v54_v25, 0.0 }
  0xa0   :  { %v59_v28 = vadd.f32 %v58_v27, %v57_v26 }
  0xa2   :  { %v61_v30 = vadd.f32 %v60_v29, %v59_v28 }
  0xa4   :  { %v63_v32 = vadd.f32 %v62_v31, %v61_v30 }
  0xa6   :  { %64 = vadd.xlane.f32.xlu0 %v63_v32 }
  0xbc   :  { %103 = vperm.xlu0 %162, %v71_v34  }
 0x12f   :  { %v65_v35 = vpop.xlane.xlu0 %64 }
 0x130   :  { %v66_v36 = vmul.f32 0.001953125, %v65_v35 }
 0x132   :  { %v67_v37 = vadd.f32 1e-05, %v66_v36  ;;  %131 = vst.msk [vmem:[%s266_s5] sm:$0xf] %vm129_vm1, %v66_v36  ;;  %s191_s5 = smov [#allocation2]  }
 0x133   :  { %s137_s7 = sshll.u32 %s191_s5, 4  ;;  %s138_s7 = int_to_ptr.vmem [resolvable:$true] %s137_s7 }
 0x134   :  { %165 = vrsqrt.f32 %v67_v37  ;;  %s167_s1 = scalar_lea.vmem %s138_s7, 256  ;;  %p172_p1 = scmp.lt.s32.totalorder %s138_s7, %s138_s7 }
 0x135   :  { %p168_p0 = scmp.ne.s32.totalorder %s138_s7, %s167_s1  ;;  %p173_p2 = scmp.lt.s32.totalorder %s167_s1, %s167_s1 }
 0x137   :  { %v104_v44 = vpop.permute.xlu0 %103  ;;  %p174_p3 = por %p173_p2, %p172_p1 }
 0x138   :  { %v115_v47 = vrot.slane %v104_v44, %v44_v16 }
 0x139   :  { %p175_p4 = pnand %p174_p3, %p168_p0 }
 0x141   :  { %v166_v39 = vpop.eup %165 }
 0x142   :  { %v73_v40 = vmul.f32 %v166_v39, %v69_v38  ;;  %v74_v42 = vmul.f32 %v166_v39, %v70_v41 }
 0x144   :  { %77 = vperm.xlu1 %161, %v73_v40  }
 0x148   :  { %81 = vperm.xlu1 %161, %v74_v42  }
 0x14c   :  { %107 = vperm.xlu1 %161, %v72_v43  }
 0x1bf   :  { %v78_v45 = vpop.permute.xlu1 %77 }
 0x1c0   :  { %v89_v46 = vrot.slane %v78_v45, %v44_v16 }
 0x1c2   :  { %v99_v48 = vmul.f32 %v89_v46, %v47_v20 }
 0x1c3   :  { %v82_v49 = vpop.permute.xlu1 %81 }
 0x1c4   :  { %v125_v50 = vadd.f32 %v115_v47, %v99_v48  ;;  %v96_v51 = vrot.slane %v82_v49, %v44_v16 }
 0x1c6   :  { %127 = vst [vmem:[#allocation2] sm:$0xff] %v125_v50  ;;  %v100_v53 = vmul.f32 %v96_v51, %v48_v21 }
 0x1c7   :  { %v108_v52 = vpop.permute.xlu1 %107 }
 0x1c8   :  { %v122_v54 = vrot.slane %v108_v52, %v44_v16 }
 0x1ca   :  { %v126_v55 = vadd.f32 %v122_v54, %v100_v53 }
 0x1cc   :  { %128 = vst [vmem:[#allocation2 + $0x8] sm:$0xff] %v126_v55 }
 0x1cd   :  { %178 = shalt.err (!%p175_p4)
}
 0x1ce   :  { %s192_s2 = smov 128   ;;  %s193_s8 = smov 8  }
 0x1cf   :  { %143 = dma.vmem_to_hbm [thread:$0]  %s138_s7, 256, %s264_s3, [#allocation3], %s192_s2, %s192_s2, %s193_s8  }
 0x1d0   :  { %187 = dma.done.wait [#allocation3], 256  }
 0x1d1   :  { %188 = vsyncadd [#allocation3], 4294967040 }
 0x1d2   :  { %155 = vsyncpa [#allocation3], 1 }

</bundles_post_ra>
